<compile_context>
chip_gen: v6e
topology: v6e:2x2x1
jax: 0.10.0
libtpu: 0.0.40
codegen_flags: <defaults>
</compile_context>

<pallas_src>
import functools
import math

import jax
import jax.numpy as jnp
from jax import lax
from jax.experimental import pallas as pl
from jax.experimental.pallas import tpu as pltpu

_LANES = 128
_SUBLANES = 8


def _diffusion_kernel(w_ref, x_ref, noise_ref, o_ref, *, tb, x_coeff):
    """One grid step: accumulate TB weighted noise slabs into the resident output.

    w_ref     : (T_pad,) f32 in SMEM (scalar prefetch) - per-step noise weights.
    x_ref     : (R, 128) f32 - flattened input image (read once at block 0).
    noise_ref : (TB, R, 128) f32 - this block's noise slab.
    o_ref     : (R, 128) f32 - resident accumulator / output.
    """
    blk = pl.program_id(0)

    # Seed the resident accumulator with the decayed input image.
    @pl.when(blk == 0)
    def _():
        o_ref[...] = x_coeff * x_ref[...]

    # Weighted sum of this block's noise steps (unrolled; no loop-carried
    # dependence on o_ref - just a local accumulator).
    def body(i, acc):
        t = blk * tb + i
        return acc + w_ref[t] * noise_ref[i]

    acc = lax.fori_loop(
        0, tb, body, jnp.zeros(o_ref.shape, jnp.float32), unroll=True
    )
    o_ref[...] = o_ref[...] + acc


def diffusion_encode(x, noise, beta, timestep, *, tb_max=32):
    """Apply `timestep` forward-diffusion noising steps to x.

    x     : (C, H, W) float32 input image.
    noise : (T, C, H, W) float32 standard-normal draws, T >= timestep
            (stand-in for torch.normal drawn once per step).
    beta, timestep : static Python scalars.
    """
    if timestep == 0:
        return x
    if noise.shape[0] < timestep:
        raise ValueError(
            f"noise has {noise.shape[0]} steps but timestep={timestep}"
        )

    orig_shape = x.shape
    orig_dtype = x.dtype
    total = math.prod(orig_shape)

    # --- lane-dense flatten: (C,H,W) -> (R, 128), R a multiple of 8 ----------
    slab = _SUBLANES * _LANES
    pad = (-total) % slab
    R = (total + pad) // _LANES

    xf = jnp.reshape(x.astype(jnp.float32), (-1,))
    nf = jnp.reshape(noise[:timestep].astype(jnp.float32), (timestep, -1))
    if pad:
        xf = jnp.pad(xf, (0, pad))
        nf = jnp.pad(nf, ((0, 0), (0, pad)))
    xf = jnp.reshape(xf, (R, _LANES))
    nf = jnp.reshape(nf, (timestep, R, _LANES))

    # --- closed-form coefficients (exact in Python float, cast to f32) -------
    a = math.sqrt(1.0 - beta)
    ns = math.sqrt(beta) / 256.0
    x_coeff = a ** timestep
    w_host = [ns * (a ** (timestep - 1 - t)) for t in range(timestep)]

    # --- timestep blocking ----------------------------------------------------
    tb = min(timestep, tb_max)
    nblk = pl.cdiv(timestep, tb)
    t_pad = nblk * tb - timestep
    if t_pad:
        nf = jnp.pad(nf, ((0, t_pad), (0, 0), (0, 0)))
        w_host = w_host + [0.0] * t_pad  # zero weight -> padded steps are no-ops
    w = jnp.asarray(w_host, dtype=jnp.float32)

    kernel = functools.partial(_diffusion_kernel, tb=tb, x_coeff=x_coeff)

    out = pl.pallas_call(
        kernel,
        out_shape=jax.ShapeDtypeStruct((R, _LANES), jnp.float32),
        grid_spec=pltpu.PrefetchScalarGridSpec(
            num_scalar_prefetch=1,            # weights -> SMEM
            grid=(nblk,),
            in_specs=[
                # Full lane-dense image tile (same block every grid step).
                pl.BlockSpec((R, _LANES), lambda b, wref: (0, 0)),
                # TB noise steps per grid iteration.
                pl.BlockSpec((tb, R, _LANES), lambda b, wref: (b, 0, 0)),
            ],
            # Constant block index across the grid -> resident accumulator.
            out_specs=pl.BlockSpec((R, _LANES), lambda b, wref: (0, 0)),
        ),
        compiler_params=pltpu.CompilerParams(
            dimension_semantics=("arbitrary",),
        ),
    )(w, xf, nf)

    out = jnp.reshape(jnp.reshape(out, (-1,))[:total], orig_shape)
    return out.astype(orig_dtype)


def _reference(x, noise, beta, timestep):
    """Step-by-step reference matching the PyTorch recurrence."""
    a = jnp.float32(math.sqrt(1.0 - beta))
    b = jnp.float32(math.sqrt(beta))
    x = x.astype(jnp.float32)
    for t in range(timestep):
        x = x * a + b * (noise[t].astype(jnp.float32) / 256.0)
    return x


if __name__ == "__main__":
    beta = 0.02
    timestep = 8
    C, H, W = 4, 16, 16

    key = jax.random.PRNGKey(0)
    kx, kn = jax.random.split(key)
    x = jax.random.normal(kx, (C, H, W), dtype=jnp.float32)
    noise = jax.random.normal(kn, (timestep, C, H, W), dtype=jnp.float32)

    out = jax.block_until_ready(diffusion_encode(x, noise, beta, timestep))
    ref = _reference(x, noise, beta, timestep)
    assert out.shape == (C, H, W)
    assert jnp.allclose(out, ref, atol=1e-5, rtol=1e-5)

    # timestep == 0 path returns the input unchanged.
    out0 = diffusion_encode(x, noise, beta, 0)
    assert jnp.array_equal(out0, x)

    # Exercise padding (non-multiple-of-1024 image) and the multi-block T path.
    C2, H2, W2 = 3, 10, 10
    T2 = 7
    k2, k3 = jax.random.split(kn)
    x2 = jax.random.normal(k2, (C2, H2, W2), dtype=jnp.float32)
    noise2 = jax.random.normal(k3, (T2, C2, H2, W2), dtype=jnp.float32)
    out2 = jax.block_until_ready(
        diffusion_encode(x2, noise2, beta, T2, tb_max=4)
    )
    ref2 = _reference(x2, noise2, beta, T2)
    assert out2.shape == (C2, H2, W2)
    assert jnp.allclose(out2, ref2, atol=1e-5, rtol=1e-5)

    print("KERNEL_OK")
</pallas_src>

<mosaic_0001>
module attributes {stable_mosaic.version = 11 : i64} {
  func.func @_diffusion_kernel(%arg0: i32, %arg1: memref<8xf32, #tpu.memory_space<smem>>, %arg2: memref<8x128xf32, #tpu.memory_space<vmem>>, %arg3: memref<8x8x128xf32, #tpu.memory_space<vmem>>, %arg4: memref<8x128xf32, #tpu.memory_space<vmem>>) attributes {dimension_semantics = [#tpu.dimension_semantics<arbitrary>], iteration_bounds = array<i64: 1>, scalar_prefetch = 1 : i64, scratch_operands = 0 : i64, tpu.core_type = #tpu.core_type<tc>, window_params = [{pipeline_mode = #tpu.pipeline_mode<synchronous>, transform_indices = @transform_0, window_bounds = array<i64: 8, 128>}, {transform_indices = @transform_1, window_bounds = array<i64: 8, 8, 128>}, {pipeline_mode = #tpu.pipeline_mode<synchronous>, transform_indices = @transform_2, window_bounds = array<i64: 8, 128>}]} {
    %c0_i32 = arith.constant 0 : i32
    %0 = arith.cmpi eq, %arg0, %c0_i32 : i32
    %1 = arith.extui %0 : i1 to i32
    %c0_i32_0 = arith.constant 0 : i32
    %2 = arith.cmpi ne, %1, %c0_i32_0 : i32
    scf.if %2 {
      %c0_29 = arith.constant 0 : index
      %c0_30 = arith.constant 0 : index
      %87 = vector.load %arg2[%c0_29, %c0_30] : memref<8x128xf32, #tpu.memory_space<vmem>>, vector<8x128xf32>
      %cst_31 = arith.constant 0.922368168 : f32
      %88 = vector.broadcast %cst_31 : f32 to vector<8x128xf32>
      %89 = arith.mulf %88, %87 : vector<8x128xf32>
      %c0_32 = arith.constant 0 : index
      %c0_33 = arith.constant 0 : index
      %90 = vector.load %arg4[%c0_32, %c0_33] : memref<8x128xf32, #tpu.memory_space<vmem>>, vector<8x128xf32>
      tpu.vector_store %arg4[%c0_32, %c0_33], %89 {strides = array<i32>} : memref<8x128xf32, #tpu.memory_space<vmem>>, vector<8x128xf32>,
    } else {
    }
    %cst = arith.constant 0.000000e+00 : f32
    %3 = vector.broadcast %cst : f32 to vector<8x128xf32>
    %c0_i32_1 = arith.constant 0 : i32
    %c8_i32 = arith.constant 8 : i32
    %4 = arith.muli %arg0, %c8_i32 : i32
    %5 = arith.addi %4, %c0_i32_1 : i32
    %6 = arith.index_cast %5 : i32 to index
    %7 = memref.load %arg1[%6] : memref<8xf32, #tpu.memory_space<smem>>
    %8 = arith.index_cast %c0_i32_1 : i32 to index
    %c0 = arith.constant 0 : index
    %c0_2 = arith.constant 0 : index
    %9 = vector.load %arg3[%8, %c0, %c0_2] : memref<8x8x128xf32, #tpu.memory_space<vmem>>, vector<1x8x128xf32>
    %10 = vector.shape_cast %9 : vector<1x8x128xf32> to vector<8x128xf32>
    %11 = vector.broadcast %7 : f32 to vector<8x128xf32>
    %12 = arith.mulf %11, %10 : vector<8x128xf32>
    %13 = arith.addf %3, %12 : vector<8x128xf32>
    %c1_i32 = arith.constant 1 : i32
    %c8_i32_3 = arith.constant 8 : i32
    %14 = arith.muli %arg0, %c8_i32_3 : i32
    %15 = arith.addi %14, %c1_i32 : i32
    %16 = arith.index_cast %15 : i32 to index
    %17 = memref.load %arg1[%16] : memref<8xf32, #tpu.memory_space<smem>>
    %18 = arith.index_cast %c1_i32 : i32 to index
    %c0_4 = arith.constant 0 : index
    %c0_5 = arith.constant 0 : index
    %19 = vector.load %arg3[%18, %c0_4, %c0_5] : memref<8x8x128xf32, #tpu.memory_space<vmem>>, vector<1x8x128xf32>
    %20 = vector.shape_cast %19 : vector<1x8x128xf32> to vector<8x128xf32>
    %21 = vector.broadcast %17 : f32 to vector<8x128xf32>
    %22 = arith.mulf %21, %20 : vector<8x128xf32>
    %23 = arith.addf %13, %22 : vector<8x128xf32>
    %c2_i32 = arith.constant 2 : i32
    %c8_i32_6 = arith.constant 8 : i32
    %24 = arith.muli %arg0, %c8_i32_6 : i32
    %25 = arith.addi %24, %c2_i32 : i32
    %26 = arith.index_cast %25 : i32 to index
    %27 = memref.load %arg1[%26] : memref<8xf32, #tpu.memory_space<smem>>
    %28 = arith.index_cast %c2_i32 : i32 to index
    %c0_7 = arith.constant 0 : index
    %c0_8 = arith.constant 0 : index
    %29 = vector.load %arg3[%28, %c0_7, %c0_8] : memref<8x8x128xf32, #tpu.memory_space<vmem>>, vector<1x8x128xf32>
    %30 = vector.shape_cast %29 : vector<1x8x128xf32> to vector<8x128xf32>
    %31 = vector.broadcast %27 : f32 to vector<8x128xf32>
    %32 = arith.mulf %31, %30 : vector<8x128xf32>
    %33 = arith.addf %23, %32 : vector<8x128xf32>
    %c3_i32 = arith.constant 3 : i32
    %c8_i32_9 = arith.constant 8 : i32
    %34 = arith.muli %arg0, %c8_i32_9 : i32
    %35 = arith.addi %34, %c3_i32 : i32
    %36 = arith.index_cast %35 : i32 to index
    %37 = memref.load %arg1[%36] : memref<8xf32, #tpu.memory_space<smem>>
    %38 = arith.index_cast %c3_i32 : i32 to index
    %c0_10 = arith.constant 0 : index
    %c0_11 = arith.constant 0 : index
    %39 = vector.load %arg3[%38, %c0_10, %c0_11] : memref<8x8x128xf32, #tpu.memory_space<vmem>>, vector<1x8x128xf32>
    %40 = vector.shape_cast %39 : vector<1x8x128xf32> to vector<8x128xf32>
    %41 = vector.broadcast %37 : f32 to vector<8x128xf32>
    %42 = arith.mulf %41, %40 : vector<8x128xf32>
    %43 = arith.addf %33, %42 : vector<8x128xf32>
    %c4_i32 = arith.constant 4 : i32
    %c8_i32_12 = arith.constant 8 : i32
    %44 = arith.muli %arg0, %c8_i32_12 : i32
    %45 = arith.addi %44, %c4_i32 : i32
    %46 = arith.index_cast %45 : i32 to index
    %47 = memref.load %arg1[%46] : memref<8xf32, #tpu.memory_space<smem>>
    %48 = arith.index_cast %c4_i32 : i32 to index
    %c0_13 = arith.constant 0 : index
    %c0_14 = arith.constant 0 : index
    %49 = vector.load %arg3[%48, %c0_13, %c0_14] : memref<8x8x128xf32, #tpu.memory_space<vmem>>, vector<1x8x128xf32>
    %50 = vector.shape_cast %49 : vector<1x8x128xf32> to vector<8x128xf32>
    %51 = vector.broadcast %47 : f32 to vector<8x128xf32>
    %52 = arith.mulf %51, %50 : vector<8x128xf32>
    %53 = arith.addf %43, %52 : vector<8x128xf32>
    %c5_i32 = arith.constant 5 : i32
    %c8_i32_15 = arith.constant 8 : i32
    %54 = arith.muli %arg0, %c8_i32_15 : i32
    %55 = arith.addi %54, %c5_i32 : i32
    %56 = arith.index_cast %55 : i32 to index
    %57 = memref.load %arg1[%56] : memref<8xf32, #tpu.memory_space<smem>>
    %58 = arith.index_cast %c5_i32 : i32 to index
    %c0_16 = arith.constant 0 : index
    %c0_17 = arith.constant 0 : index
    %59 = vector.load %arg3[%58, %c0_16, %c0_17] : memref<8x8x128xf32, #tpu.memory_space<vmem>>, vector<1x8x128xf32>
    %60 = vector.shape_cast %59 : vector<1x8x128xf32> to vector<8x128xf32>
    %61 = vector.broadcast %57 : f32 to vector<8x128xf32>
    %62 = arith.mulf %61, %60 : vector<8x128xf32>
    %63 = arith.addf %53, %62 : vector<8x128xf32>
    %c6_i32 = arith.constant 6 : i32
    %c8_i32_18 = arith.constant 8 : i32
    %64 = arith.muli %arg0, %c8_i32_18 : i32
    %65 = arith.addi %64, %c6_i32 : i32
    %66 = arith.index_cast %65 : i32 to index
    %67 = memref.load %arg1[%66] : memref<8xf32, #tpu.memory_space<smem>>
    %68 = arith.index_cast %c6_i32 : i32 to index
    %c0_19 = arith.constant 0 : index
    %c0_20 = arith.constant 0 : index
    %69 = vector.load %arg3[%68, %c0_19, %c0_20] : memref<8x8x128xf32, #tpu.memory_space<vmem>>, vector<1x8x128xf32>
    %70 = vector.shape_cast %69 : vector<1x8x128xf32> to vector<8x128xf32>
    %71 = vector.broadcast %67 : f32 to vector<8x128xf32>
    %72 = arith.mulf %71, %70 : vector<8x128xf32>
    %73 = arith.addf %63, %72 : vector<8x128xf32>
    %c7_i32 = arith.constant 7 : i32
    %c8_i32_21 = arith.constant 8 : i32
    %74 = arith.muli %arg0, %c8_i32_21 : i32
    %75 = arith.addi %74, %c7_i32 : i32
    %76 = arith.index_cast %75 : i32 to index
    %77 = memref.load %arg1[%76] : memref<8xf32, #tpu.memory_space<smem>>
    %78 = arith.index_cast %c7_i32 : i32 to index
    %c0_22 = arith.constant 0 : index
    %c0_23 = arith.constant 0 : index
    %79 = vector.load %arg3[%78, %c0_22, %c0_23] : memref<8x8x128xf32, #tpu.memory_space<vmem>>, vector<1x8x128xf32>
    %80 = vector.shape_cast %79 : vector<1x8x128xf32> to vector<8x128xf32>
    %81 = vector.broadcast %77 : f32 to vector<8x128xf32>
    %82 = arith.mulf %81, %80 : vector<8x128xf32>
    %83 = arith.addf %73, %82 : vector<8x128xf32>
    %c8_i32_24 = arith.constant 8 : i32
    %c0_25 = arith.constant 0 : index
    %c0_26 = arith.constant 0 : index
    %84 = vector.load %arg4[%c0_25, %c0_26] : memref<8x128xf32, #tpu.memory_space<vmem>>, vector<8x128xf32>
    %85 = arith.addf %84, %83 : vector<8x128xf32>
    %c0_27 = arith.constant 0 : index
    %c0_28 = arith.constant 0 : index
    %86 = vector.load %arg4[%c0_27, %c0_28] : memref<8x128xf32, #tpu.memory_space<vmem>>, vector<8x128xf32>
    tpu.vector_store %arg4[%c0_27, %c0_28], %85 {strides = array<i32>} : memref<8x128xf32, #tpu.memory_space<vmem>>, vector<8x128xf32>,
    return
  }
  func.func @transform_0(%arg0: i32, %arg1: memref<8xf32, #tpu.memory_space<smem>>) -> (i32, i32) {
    %c0_i32 = arith.constant 0 : i32
    %c0_i32_0 = arith.constant 0 : i32
    %c0_i32_1 = arith.constant 0 : i32
    return %c0_i32, %c0_i32_0 : i32, i32
  }
  func.func @transform_1(%arg0: i32, %arg1: memref<8xf32, #tpu.memory_space<smem>>) -> (i32, i32, i32) {
    %c0_i32 = arith.constant 0 : i32
    %c0_i32_0 = arith.constant 0 : i32
    %c0_i32_1 = arith.constant 0 : i32
    return %arg0, %c0_i32, %c0_i32_0 : i32, i32, i32
  }
  func.func @transform_2(%arg0: i32, %arg1: memref<8xf32, #tpu.memory_space<smem>>) -> (i32, i32) {
    %c0_i32 = arith.constant 0 : i32
    %c0_i32_0 = arith.constant 0 : i32
    %c0_i32_1 = arith.constant 0 : i32
    return %c0_i32, %c0_i32_0 : i32, i32
  }
}

</mosaic_0001>

<bundles_post_ra>
// kernel: tpu_custom_call.1
= control target key start
LH: loop header
LB: loop body
LE: loop exit
PB: predicated region body
PF: predicated region fallthrough
CT: control target
= control target key end

     0   :  { %s213_s12 = smov [#allocation3]   ;;  %s251_s0 = inlined_call_operand.hbm [shape: f32[8], index: 0, kind: input, shape index: {}]   ;;  %s252_s1 = inlined_call_operand.hbm [shape: f32[8,128], index: 1, kind: input, shape index: {}]   ;;  %s253_s2 = inlined_call_operand.hbm [shape: f32[8,8,128], index: 2, kind: input, shape index: {}]   ;;  %s254_s3 = inlined_call_operand.hbm [shape: f32[8,128], index: 3, kind: output, shape index: {}]  }
   0x1   :  { %9 = dma.hbm_to_smem %s251_s0, 16, %s213_s12, [#allocation2] }
   0x2   :  { %205 = dma.done.wait [#allocation2], 16 }
   0x3   :  { %206 = vsyncadd [#allocation2], 4294967280 }
   0x4   :  { %11 = sfence }
   0x5   :  { %12 = vsyncpa [#allocation5], 0 }
   0x6   :  { %13 = vsyncpa [#allocation8], 0 }
   0x7   :  { %14 = vsyncpa [#allocation6], 0  ;;  %s214_s15 = smov [#allocation4]   ;;  %s215_s17 = smov [#allocation7]  }
   0x8   :  { %s21_s16 = sshll.u32 %s214_s15, 4  ;;  %s30_s18 = sshll.u32 %s215_s17, 4  ;;  %s22_s16 = int_to_ptr.vmem [resolvable:$true] %s21_s16  ;;  %s31_s18 = int_to_ptr.vmem [resolvable:$true] %s30_s18 }
   0x9   :  { %s153_s19 = scalar_lea.vmem %s22_s16, 128  ;;  %p158_p1 = scmp.lt.s32.totalorder %s22_s16, %s22_s16 }
   0xa   :  { %p154_p0 = scmp.ne.s32.totalorder %s22_s16, %s153_s19  ;;  %p159_p2 = scmp.lt.s32.totalorder %s153_s19, %s153_s19 }
   0xc   :  { %p160_p3 = por %p159_p2, %p158_p1 }
   0xe   :  { %p161_p4 = pnand %p160_p3, %p154_p0 }
  0x10   :  { %164 = shalt.err (!%p161_p4)
}
  0x11   :  { %24 = dma.hbm_to_vmem [thread:$0]  %s252_s1, 128, %s22_s16, [#allocation5]  }
  0x12   :  { %s173_s21 = scalar_lea.vmem %s31_s18, 1024  ;;  %p178_p6 = scmp.lt.s32.totalorder %s31_s18, %s31_s18 }
  0x13   :  { %p174_p5 = scmp.ne.s32.totalorder %s31_s18, %s173_s21  ;;  %p179_p7 = scmp.lt.s32.totalorder %s173_s21, %s173_s21 }
  0x15   :  { %p180_p8 = por %p179_p7, %p178_p6 }
  0x17   :  { %p181_p9 = pnand %p180_p8, %p174_p5 }
  0x19   :  { %184 = shalt.err (!%p181_p9)
}
  0x1a   :  { %s216_s22 = smov 128   ;;  %s217_s23 = smov 8  }
  0x1b   :  { %36 = dma.hbm_to_vmem [thread:$0]  %s253_s2, 1024, %s31_s18, [#allocation8], %s216_s22, %s216_s22, %s217_s23  }
  0x1c   :  { %207 = dma.done.wait [#allocation5], 128  }
  0x1d   :  { %208 = vsyncadd [#allocation5], 4294967168 }
  0x1e   :  { %209 = dma.done.wait [#allocation8], 1024  }
  0x1f   :  { %210 = vsyncadd [#allocation8], 4294966272  ;;  %s51_s26 = sld [smem:[#allocation3]]  ;;  %v52_v0 = vld [vmem:[#allocation7] sm:$0xff]  ;;  %v59_v2 = vld [vmem:[#allocation7 + $0x8] sm:$0xff]  ;;  %s218_s5 = smov [#allocation9]  }
  0x20   :  { %s124_s27 = sld [smem:[#allocation3 + $0x1]]  ;;  %v66_v5 = vld [vmem:[#allocation7 + $0x10] sm:$0xff]  ;;  %v73_v6 = vld [vmem:[#allocation7 + $0x18] sm:$0xff]  ;;  %v80_v11 = vld [vmem:[#allocation7 + $0x20] sm:$0xff]  ;;  %s114_s6 = sshll.u32 %s218_s5, 4  ;;  %s115_s6 = int_to_ptr.vmem [resolvable:$true] %s114_s6 }
  0x21   :  { %s125_s1 = sld [smem:[#allocation3 + $0x2]]  ;;  %v87_v15 = vld [vmem:[#allocation7 + $0x28] sm:$0xff]  ;;  %v94_v19 = vld [vmem:[#allocation7 + $0x30] sm:$0xff]  ;;  %v101_v23 = vld [vmem:[#allocation7 + $0x38] sm:$0xff]  ;;  %s185_s7 = scalar_lea.vmem %s115_s6, 128 }
  0x22   :  { %s126_s28 = sld [smem:[#allocation3 + $0x3]]  ;;  %v47_v27 = vld [vmem:[#allocation4] sm:$0xff]  ;;  %p186_p10 = scmp.ne.s32.totalorder %s115_s6, %s185_s7 }
  0x23   :  { %s127_s29 = sld [smem:[#allocation3 + $0x4]]  ;;  %v48_v30 = vmul.f32 0.92236817, %v47_v27  ;;  %p190_p11 = scmp.lt.s32.totalorder %s115_s6, %s115_s6 }
  0x24   :  { %s128_s30 = sld [smem:[#allocation3 + $0x5]]  ;;  %p191_p12 = scmp.lt.s32.totalorder %s185_s7, %s185_s7 }
  0x25   :  { %v53_v1 = vstv %s51_s26  ;;  %s129_s4 = sld [smem:[#allocation3 + $0x6]] }
  0x26   :  { %v54_v3 = vmul.f32 %v53_v1, %v52_v0  ;;  %v60_v4 = vstv %s124_s27  ;;  %s130_s2 = sld [smem:[#allocation3 + $0x7]]  ;;  %p192_p13 = por %p191_p12, %p190_p11 }
  0x27   :  { %v61_v7 = vmul.f32 %v60_v4, %v59_v2  ;;  %v67_v8 = vstv %s125_s1 }
  0x28   :  { %v68_v9 = vmul.f32 %v67_v8, %v66_v5  ;;  %v74_v10 = vstv %s126_s28  ;;  %p193_p0 = pnand %p192_p13, %p186_p10 }
  0x29   :  { %v62_v12 = vadd.f32 %v61_v7, %v54_v3  ;;  %v75_v13 = vmul.f32 %v74_v10, %v73_v6  ;;  %v81_v14 = vstv %s127_s29 }
  0x2a   :  { %v88_v16 = vstv %s128_s30  ;;  %v82_v18 = vmul.f32 %v81_v14, %v80_v11 }
  0x2b   :  { %v69_v17 = vadd.f32 %v68_v9, %v62_v12  ;;  %v95_v20 = vstv %s129_s4  ;;  %v89_v22 = vmul.f32 %v88_v16, %v87_v15 }
  0x2c   :  { %v102_v24 = vstv %s130_s2  ;;  %v96_v26 = vmul.f32 %v95_v20, %v94_v19 }
  0x2d   :  { %v76_v21 = vadd.f32 %v75_v13, %v69_v17  ;;  %v103_v29 = vmul.f32 %v102_v24, %v101_v23 }
  0x2f   :  { %v83_v25 = vadd.f32 %v82_v18, %v76_v21 }
  0x31   :  { %v90_v28 = vadd.f32 %v89_v22, %v83_v25 }
  0x33   :  { %v97_v31 = vadd.f32 %v96_v26, %v90_v28 }
  0x35   :  { %v104_v32 = vadd.f32 %v103_v29, %v97_v31 }
  0x37   :  { %v106_v33 = vadd.f32 %v104_v32, %v48_v30 }
  0x39   :  { %107 = vst [vmem:[#allocation9] sm:$0xff] %v106_v33 }
  0x3a   :  { %196 = shalt.err (!%p193_p0)
}
  0x3b   :  { %117 = dma.vmem_to_hbm [thread:$0]  %s115_s6, 128, %s254_s3, [#allocation6]  }
  0x3c   :  { %211 = dma.done.wait [#allocation6], 128  }
  0x3d   :  { %212 = vsyncadd [#allocation6], 4294967168 }
  0x3e   :  { %121 = vsyncpa [#allocation5], 1 }
  0x3f   :  { %122 = vsyncpa [#allocation8], 1 }
  0x40   :  { %123 = vsyncpa [#allocation6], 1 }

</bundles_post_ra>
